<compile_context>
chip_gen: v5e
topology: v5e:2x2
jax: 0.10.0
libtpu: 0.0.40
codegen_flags: <defaults>
</compile_context>

<pallas_src>
import jax
import jax.numpy as jnp
from jax.experimental import pallas as pl
from jax.experimental.pallas import tpu as pltpu


def linear_kernel(x_ref, w_ref, b_ref, o_ref):
    # x_ref: (TM, K) VMEM, w_ref: (K, 1) VMEM, b_ref: (1,) SMEM, o_ref: (TM, 1) VMEM.
    # MXU contraction (f32 accumulate) + scalar bias add; VPU/XLU stay free,
    # so the kernel remains HBM-bound on the x-tile DMA.
    o_ref[...] = (
        jnp.dot(x_ref[...], w_ref[...], preferred_element_type=jnp.float32)
        + b_ref[0]
    )


def linear_pallas(x, weight, bias, *, max_tile_m=2048):
    """y = x @ weight.T + bias  (PyTorch nn.Linear semantics).

    x:      (B, in_features)              f32
    weight: (out_features, in_features)   f32  (native PyTorch layout)
    bias:   (out_features,)               f32
    returns (B, out_features) f32
    """
    B, K = x.shape
    N, K2 = weight.shape
    assert K == K2, f"in_features mismatch: {K} vs {K2}"
    # Scalar-bias read in the kernel is only valid for a single output feature,
    # which is what this module (nn.Linear(128, 1)) specifies.
    assert N == 1, "this kernel is specialized for out_features == 1"

    # One-time 512-byte transpose in the wrapper so the kernel can feed the MXU
    # directly with a (K, N) column.
    w_col = weight.T  # (K, 1)

    # Tile the batch: one full block if small, else 2048-row (multiple of 8)
    # tiles so the pipeline double-buffers the x DMA against compute and the
    # ~0.35 us per-grid-step overhead is amortized.  2048x128 f32 = 1 MiB per
    # buffer -> well inside scoped VMEM on all generations.
    tm = B if B <= max_tile_m else max_tile_m
    grid_m = pl.cdiv(B, tm)
    grid = (grid_m,)

    cost = pl.CostEstimate(
        flops=2 * B * K * N,
        transcendentals=0,
        # x once, weight column potentially re-fetched per grid step, bias,
        # and the output writeback.
        bytes_accessed=4 * (B * K + grid_m * K * N + N + B * N),
    )

    return pl.pallas_call(
        linear_kernel,
        out_shape=jax.ShapeDtypeStruct((B, N), jnp.float32),
        grid=grid,
        in_specs=[
            pl.BlockSpec((tm, K), lambda i: (i, 0)),   # x: batch-tiled
            pl.BlockSpec((K, N), lambda i: (0, 0)),    # weight column: resident
            pl.BlockSpec(memory_space=pltpu.SMEM),     # bias: whole (1,) array in SMEM
        ],
        out_specs=pl.BlockSpec((tm, N), lambda i: (i, 0)),
        compiler_params=pltpu.CompilerParams(
            # Batch tiles are independent; lets megacore shard the grid.
            # TODO(synk): for v7x production paths consider pltpu.CORE_PARALLEL /
            # pl.core_map to guarantee both TensorCores are used for large B.
            dimension_semantics=("parallel",),
        ),
        cost_estimate=cost,
    )(x, w_col, bias)


if __name__ == "__main__":
    key = jax.random.PRNGKey(0)
    k_x, k_w, k_b, k_x2 = jax.random.split(key, 4)

    B, in_features, out_features = 8, 128, 1

    # Deterministic parameter init (mimics nn.Linear's uniform(-1/sqrt(fan_in), ...))
    bound = 1.0 / jnp.sqrt(jnp.float32(in_features))
    weight = jax.random.uniform(
        k_w, (out_features, in_features), jnp.float32, -bound, bound
    )
    bias = jax.random.uniform(k_b, (out_features,), jnp.float32, -bound, bound)

    # --- small single-tile check (grid = 1) ---
    x = jax.random.normal(k_x, (B, in_features), jnp.float32)
    y = linear_pallas(x, weight, bias)
    jax.block_until_ready(y)
    y_ref = x @ weight.T + bias
    assert y.shape == (B, out_features)
    assert jnp.allclose(y, y_ref, atol=1e-5, rtol=1e-5)

    # --- small multi-tile check (exercise the grid / pipelined path) ---
    B2 = 48
    x2 = jax.random.normal(k_x2, (B2, in_features), jnp.float32)
    y2 = linear_pallas(x2, weight, bias, max_tile_m=16)  # grid = 3
    jax.block_until_ready(y2)
    y2_ref = x2 @ weight.T + bias
    assert y2.shape == (B2, out_features)
    assert jnp.allclose(y2, y2_ref, atol=1e-5, rtol=1e-5)

    print("KERNEL_OK")
</pallas_src>

<mosaic_0001>
module attributes {stable_mosaic.version = 11 : i64} {
  func.func @linear_kernel(%arg0: i32, %arg1: memref<8x128xf32, #tpu.memory_space<vmem>>, %arg2: memref<128x1xf32, #tpu.memory_space<vmem>>, %arg3: memref<1xf32, #tpu.memory_space<smem>>, %arg4: memref<8x1xf32, #tpu.memory_space<vmem>>) attributes {dimension_semantics = [#tpu.dimension_semantics<parallel>], iteration_bounds = array<i64: 1>, scalar_prefetch = 0 : i64, scratch_operands = 0 : i64, tpu.core_type = #tpu.core_type<tc>, window_params = [{transform_indices = @transform_0, window_bounds = array<i64: 8, 128>}, {pipeline_mode = #tpu.pipeline_mode<synchronous>, transform_indices = @transform_1, window_bounds = array<i64: 128, 1>}, {transform_indices = @transform_2, window_bounds = array<i64: 1>}, {transform_indices = @transform_3, window_bounds = array<i64: 8, 1>}]} {
    %c0 = arith.constant 0 : index
    %c0_0 = arith.constant 0 : index
    %0 = vector.load %arg1[%c0, %c0_0] : memref<8x128xf32, #tpu.memory_space<vmem>>, vector<8x128xf32>
    %c0_1 = arith.constant 0 : index
    %c0_2 = arith.constant 0 : index
    %1 = vector.load %arg2[%c0_1, %c0_2] : memref<128x1xf32, #tpu.memory_space<vmem>>, vector<128x1xf32>
    %cst = arith.constant dense<0.000000e+00> : vector<8x1xf32>
    %2 = tpu.matmul %0, %1, %cst {dimension_numbers = #tpu.dot_dimension_numbers<[1], [0], [0], [1], [0, 0, 1, 1], [], []>} : vector<8x128xf32>, vector<128x1xf32>, vector<8x1xf32> -> vector<8x1xf32>
    %c0_3 = arith.constant 0 : index
    %3 = memref.load %arg3[%c0_3] : memref<1xf32, #tpu.memory_space<smem>>
    %4 = vector.broadcast %3 : f32 to vector<8x1xf32>
    %5 = arith.addf %2, %4 : vector<8x1xf32>
    %c0_4 = arith.constant 0 : index
    %c0_5 = arith.constant 0 : index
    %6 = vector.load %arg4[%c0_4, %c0_5] : memref<8x1xf32, #tpu.memory_space<vmem>>, vector<8x1xf32>
    tpu.vector_store %arg4[%c0_4, %c0_5], %5 {strides = array<i32>} : memref<8x1xf32, #tpu.memory_space<vmem>>, vector<8x1xf32>,
    return
  }
  func.func @transform_0(%arg0: i32) -> (i32, i32) {
    %c0_i32 = arith.constant 0 : i32
    %c0_i32_0 = arith.constant 0 : i32
    return %arg0, %c0_i32 : i32, i32
  }
  func.func @transform_1(%arg0: i32) -> (i32, i32) {
    %c0_i32 = arith.constant 0 : i32
    %c0_i32_0 = arith.constant 0 : i32
    %c0_i32_1 = arith.constant 0 : i32
    return %c0_i32, %c0_i32_0 : i32, i32
  }
  func.func @transform_2(%arg0: i32) -> i32 {
    %c0_i32 = arith.constant 0 : i32
    %c0_i32_0 = arith.constant 0 : i32
    return %c0_i32 : i32
  }
  func.func @transform_3(%arg0: i32) -> (i32, i32) {
    %c0_i32 = arith.constant 0 : i32
    %c0_i32_0 = arith.constant 0 : i32
    return %arg0, %c0_i32 : i32, i32
  }
}

</mosaic_0001>

<bundles_post_ra>
// kernel: tpu_custom_call.1
= control target key start
LH: loop header
LB: loop body
LE: loop exit
PB: predicated region body
PF: predicated region fallthrough
CT: control target
= control target key end

     0   :  { %vm54_vm0 = vcmask 7168   ;;  %s137_s1 = inlined_call_operand.vmem [shape: f32[128,1], index: 1, kind: input, shape index: {}]   ;;  %s138_s0 = inlined_call_operand.vmem [shape: f32[8,128], index: 0, kind: input, shape index: {}]   ;;  %s139_s2 = inlined_call_operand.<no memory space> [shape: f32[1], index: 2, kind: input, shape index: {}]   ;;  %s140_s3 = inlined_call_operand.vmem [shape: f32[8,1], index: 3, kind: output, shape index: {}]  }
   0x1   :  { %v31_v0 = vld [vmem:[%s137_s1 + $0x78] sm:$0xff]  ;;  %v30_v1 = vld [vmem:[%s137_s1 + $0x70] sm:$0xff]  ;;  %v29_v2 = vld [vmem:[%s137_s1 + $0x68] sm:$0xff]  ;;  %v33_v17 = vstv %s139_s2 }
   0x2   :  { %34 = vmatpush.msra.mxu0 %v31_v0  ;;  %v28_v3 = vld [vmem:[%s137_s1 + $0x60] sm:$0xff]  ;;  %v27_v4 = vld [vmem:[%s137_s1 + $0x58] sm:$0xff]  ;;  %v26_v5 = vld [vmem:[%s137_s1 + $0x50] sm:$0xff] }
   0x3   :  { %v25_v6 = vld [vmem:[%s137_s1 + $0x48] sm:$0xff]  ;;  %v24_v7 = vld [vmem:[%s137_s1 + $0x40] sm:$0xff]  ;;  %v23_v8 = vld [vmem:[%s137_s1 + $0x38] sm:$0xff] }
   0x4   :  { %35 = vmatpush.msra.mxu0 %v30_v1  ;;  %v22_v9 = vld [vmem:[%s137_s1 + $0x30] sm:$0xff]  ;;  %v21_v10 = vld [vmem:[%s137_s1 + $0x28] sm:$0xff]  ;;  %v20_v11 = vld [vmem:[%s137_s1 + $0x20] sm:$0xff] }
   0x5   :  { %v19_v12 = vld [vmem:[%s137_s1 + $0x18] sm:$0xff]  ;;  %v18_v13 = vld [vmem:[%s137_s1 + $0x10] sm:$0xff]  ;;  %v17_v14 = vld [vmem:[%s137_s1 + $0x8] sm:$0xff] }
   0x6   :  { %36 = vmatpush.msra.mxu0 %v29_v2  ;;  %v16_v15 = vld [vmem:[%s137_s1] sm:$0xff] }
   0x7   :  { %v15_v16 = vld [vmem:[%s138_s0] sm:$0xff] }
   0x8   :  { %37 = vmatpush.msra.mxu0 %v28_v3 }
   0xa   :  { %38 = vmatpush.msra.mxu0 %v27_v4 }
   0xc   :  { %39 = vmatpush.msra.mxu0 %v26_v5 }
   0xe   :  { %40 = vmatpush.msra.mxu0 %v25_v6 }
  0x10   :  { %41 = vmatpush.msra.mxu0 %v24_v7 }
  0x12   :  { %42 = vmatpush.msra.mxu0 %v23_v8 }
  0x14   :  { %43 = vmatpush.msra.mxu0 %v22_v9 }
  0x16   :  { %44 = vmatpush.msra.mxu0 %v21_v10 }
  0x18   :  { %45 = vmatpush.msra.mxu0 %v20_v11 }
  0x1a   :  { %46 = vmatpush.msra.mxu0 %v19_v12 }
  0x1c   :  { %47 = vmatpush.msra.mxu0 %v18_v13 }
  0x1e   :  { %48 = vmatpush.msra.mxu0 %v17_v14 }
  0x20   :  { %49 = vmatpush.msra.mxu0 %v16_v15 }
  0x21   :  { %50 = vmatmul.f32.vlgmr.msra.gmra.mxu0 %v15_v16 }
  0x9e   :  { %v51_v18 = vpop.f32.mrf.mxu0 }
  0x9f   :  { %v52_v19 = vadd.f32 %v51_v18, %v33_v17 }
  0xa1   :  { %55 = vst.msk [vmem:[%s140_s3] sm:$0xff] %vm54_vm0, %v52_v19 }

</bundles_post_ra>
